<compile_context>
chip_gen: v7x
topology: tpu7x:2x2x1
jax: 0.10.0
libtpu: 0.0.40
codegen_flags: <defaults>
</compile_context>

<pallas_src>
import numpy as np
import jax
import jax.numpy as jnp
from jax.experimental import pallas as pl
from jax.experimental.pallas import tpu as pltpu


def get_stack_num(input_len, target_seq_len, embed_dim):
    """Mirror of Embeddings1D.get_stack_num."""
    if embed_dim == 768:
        for i in range(1, input_len + 1):
            if input_len % i == 0 and input_len // i <= target_seq_len:
                return i
    else:
        for i in range(1, input_len + 1):
            root = np.sqrt(input_len // i)
            if (input_len % i == 0 and input_len // i <= target_seq_len
                    and (int(root + 0.5) ** 2 == input_len // i)):
                return i
    return input_len


def _choose_seq_tile(S, E, CK1, vmem_budget_bytes=24 << 20, max_rows=512):
    """VMEM-budget-driven sequence tile (multiple of 8 rows, <= max_rows).

    Per-step footprint ~= 2 (double buffer) * TS * (CK1 + 2*E) * 4 B plus the
    resident (CK1, E) weight -- kept well under the 32 MiB scoped default so the
    same tiling is safe on v7x's 64 MiB physical VMEM.
    """
    bytes_per_row = 2 * (CK1 + 2 * E) * 4
    cap = min(max_rows, max(8, vmem_budget_bytes // max(bytes_per_row, 1)))
    cap -= cap % 8
    cap = max(cap, 8)
    if S <= cap:
        return S
    # Prefer a divisor of S (no masked tail block); otherwise just use the cap.
    for t in range(cap, 7, -8):
        if S % t == 0:
            return t
    return cap


def _embed1d_kernel(patch_ref, w_ref, gamma_ref, shift_ref, out_ref):
    # patch_ref: (TS, CK1)  (batch dim squeezed; last column is ones for the bias)
    # w_ref:     (CK1, E)   (last row is the conv bias)
    # gamma_ref: (1, E)     LayerNorm weight
    # shift_ref: (TS, E)    positional embedding + LayerNorm beta (pre-folded)
    # out_ref:   (TS, E)
    # Conv1d (stride == kernel) as one MXU matmul with f32 accumulation; the
    # conv bias rides along via the ones column.
    y = jnp.dot(patch_ref[...], w_ref[...], preferred_element_type=jnp.float32)

    # Two-pass LayerNorm statistics over E (PyTorch eps=1e-5, biased variance).
    e = y.shape[-1]
    inv_e = jnp.float32(1.0 / e)
    mean = jnp.sum(y, axis=-1, keepdims=True) * inv_e
    yc = y - mean
    var = jnp.sum(yc * yc, axis=-1, keepdims=True) * inv_e
    inv = jax.lax.rsqrt(var + 1e-5)

    # (y - mean) * inv * gamma + (pos + beta)
    out_ref[...] = (yc * inv * gamma_ref[...] + shift_ref[...]).astype(out_ref.dtype)


def embeddings1d_forward(x, conv_w, conv_b, ln_gamma, ln_beta, pos_table,
                         embed_dim, target_seq_len, padding_idx=1,
                         out_dtype=None):
    """x: (B, C, L) float32.  Returns (B, S, E) (plus patched_dimensions if
    embed_dim != 768), matching Embeddings1D.forward."""
    B, C, L = x.shape
    K = get_stack_num(L, target_seq_len, embed_dim)
    S = L // K
    E = embed_dim
    CK = C * K
    CK1 = CK + 1
    out_dtype = x.dtype if out_dtype is None else out_dtype

    assert padding_idx + 1 + S <= pos_table.shape[0], "position ids exceed pos table"

    # ---- glue: layout plumbing only ------------------------------------------
    # patches[b, s, c*K + k] = x[b, c, s*K + k]  (matches Conv1d weight (E,C,K) flattening)
    patches = x.reshape(B, C, S, K).transpose(0, 2, 1, 3).reshape(B, S, CK)
    # Fold the conv bias: ones column in patches, bias row appended to the weight.
    patches = jnp.concatenate(
        [patches, jnp.ones((B, S, 1), dtype=patches.dtype)], axis=-1)        # (B, S, CK1)
    w_flat = jnp.concatenate(
        [conv_w.reshape(E, CK).T, conv_b.reshape(1, E)], axis=0)             # (CK1, E)

    # create_position_ids_from_inputs_embeds: padding_idx+1 + arange(S) -> contiguous slice.
    pos_emb = jax.lax.dynamic_slice_in_dim(pos_table, padding_idx + 1, S, axis=0)  # (S, E)
    # Fold LayerNorm beta into the positional shift; NOT batch-tiled (kernel reuses it).
    shift = pos_emb + ln_beta[None, :]                                        # (S, E)

    gamma2d = ln_gamma.reshape(1, E)

    # ---- tiling: (S_tiles, B) grid, B innermost so the pos tile is reused -----
    TS = _choose_seq_tile(S, E, CK1)
    num_s_tiles = pl.cdiv(S, TS)

    out = pl.pallas_call(
        _embed1d_kernel,
        out_shape=jax.ShapeDtypeStruct((B, S, E), out_dtype),
        grid_spec=pltpu.PrefetchScalarGridSpec(
            num_scalar_prefetch=0,
            grid=(num_s_tiles, B),
            in_specs=[
                # patches row tile (batch dim squeezed out of the kernel view)
                pl.BlockSpec((None, TS, CK1), lambda s, b: (b, s, 0)),
                # conv weight (+bias row): grid-invariant, DMA'd once
                pl.BlockSpec((CK1, E), lambda s, b: (0, 0)),
                # LayerNorm gamma: grid-invariant
                pl.BlockSpec((1, E), lambda s, b: (0, 0)),
                # pos + beta tile: ignores the (innermost) batch index -> no re-DMA per batch
                pl.BlockSpec((TS, E), lambda s, b: (s, 0)),
            ],
            out_specs=pl.BlockSpec((None, TS, E), lambda s, b: (b, s, 0)),
        ),
        compiler_params=pltpu.CompilerParams(
            dimension_semantics=("parallel", "parallel")),   # megacore split on v7x
    )(patches, w_flat, gamma2d, shift)

    if embed_dim == 768:
        return out
    root = int(np.sqrt(S))
    return out, (root, root)


def _reference(x, conv_w, conv_b, ln_gamma, ln_beta, pos_table,
               embed_dim, target_seq_len, padding_idx=1):
    """Pure-JAX reference of the PyTorch forward, for correctness checking."""
    B, C, L = x.shape
    K = get_stack_num(L, target_seq_len, embed_dim)
    S = L // K
    E = embed_dim
    patches = x.reshape(B, C, S, K).transpose(0, 2, 1, 3).reshape(B, S, C * K)
    y = patches @ conv_w.reshape(E, C * K).T + conv_b                  # (B, S, E)
    mean = y.mean(-1, keepdims=True)
    var = ((y - mean) ** 2).mean(-1, keepdims=True)
    y = (y - mean) / jnp.sqrt(var + 1e-5) * ln_gamma + ln_beta
    position_ids = padding_idx + 1 + jnp.arange(S, dtype=jnp.int32)
    return y + pos_table[position_ids][None]


if __name__ == "__main__":
    # Small shapes consistent with the module defaults (embed_dim=768 branch).
    B, C, L = 2, 4, 96
    embed_dim, target_seq_len, padding_idx = 768, 64, 1
    K = get_stack_num(L, target_seq_len, embed_dim)   # -> 2
    S = L // K                                        # -> 48

    key = jax.random.PRNGKey(0)
    kx, kw, kb, kp = jax.random.split(key, 4)
    x = jax.random.normal(kx, (B, C, L), dtype=jnp.float32)

    # Deterministic synthetic parameters (shapes from __init__; conv_init is just
    # an initializer, so arbitrary values preserve the forward semantics).
    conv_w = jax.random.normal(kw, (embed_dim, C, K), dtype=jnp.float32) * 0.02
    conv_b = jax.random.normal(kb, (embed_dim,), dtype=jnp.float32) * 0.02
    ln_gamma = jnp.ones((embed_dim,), dtype=jnp.float32)               # nn.LayerNorm default init
    ln_beta = jnp.zeros((embed_dim,), dtype=jnp.float32)
    pos_table = jax.random.normal(kp, (target_seq_len, embed_dim), dtype=jnp.float32)
    pos_table = pos_table.at[padding_idx].set(0.0)                     # padding_idx row zeroed

    out = embeddings1d_forward(x, conv_w, conv_b, ln_gamma, ln_beta, pos_table,
                               embed_dim, target_seq_len, padding_idx)
    out = jax.block_until_ready(out)

    ref = _reference(x, conv_w, conv_b, ln_gamma, ln_beta, pos_table,
                     embed_dim, target_seq_len, padding_idx)
    assert out.shape == (B, S, embed_dim), out.shape
    np.testing.assert_allclose(np.asarray(out), np.asarray(ref), rtol=1e-4, atol=1e-4)
    print("KERNEL_OK")
</pallas_src>

<mosaic_0001>
module attributes {stable_mosaic.version = 11 : i64} {
  func.func @_embed1d_kernel(%arg0: i32, %arg1: i32, %arg2: memref<1x48x9xf32, #tpu.memory_space<vmem>>, %arg3: memref<9x768xf32, #tpu.memory_space<vmem>>, %arg4: memref<1x768xf32, #tpu.memory_space<vmem>>, %arg5: memref<48x768xf32, #tpu.memory_space<vmem>>, %arg6: memref<1x48x768xf32, #tpu.memory_space<vmem>>) attributes {dimension_semantics = [#tpu.dimension_semantics<parallel>, #tpu.dimension_semantics<parallel>], iteration_bounds = array<i64: 1, 2>, scalar_prefetch = 0 : i64, scratch_operands = 0 : i64, tpu.core_type = #tpu.core_type<tc>, window_params = [{transform_indices = @transform_0, window_bounds = array<i64: 1, 48, 9>}, {pipeline_mode = #tpu.pipeline_mode<synchronous>, transform_indices = @transform_1, window_bounds = array<i64: 9, 768>}, {pipeline_mode = #tpu.pipeline_mode<synchronous>, transform_indices = @transform_2, window_bounds = array<i64: 1, 768>}, {transform_indices = @transform_3, window_bounds = array<i64: 48, 768>}, {transform_indices = @transform_4, window_bounds = array<i64: 1, 48, 768>}]} {
    %c0 = arith.constant 0 : index
    %c0_0 = arith.constant 0 : index
    %c0_1 = arith.constant 0 : index
    %0 = vector.load %arg2[%c0, %c0_0, %c0_1] : memref<1x48x9xf32, #tpu.memory_space<vmem>>, vector<1x48x9xf32>
    %1 = vector.shape_cast %0 : vector<1x48x9xf32> to vector<48x9xf32>
    %c0_2 = arith.constant 0 : index
    %c0_3 = arith.constant 0 : index
    %2 = vector.load %arg3[%c0_2, %c0_3] : memref<9x768xf32, #tpu.memory_space<vmem>>, vector<9x768xf32>
    %cst = arith.constant dense<0.000000e+00> : vector<48x768xf32>
    %3 = tpu.matmul %1, %2, %cst {dimension_numbers = #tpu.dot_dimension_numbers<[1], [0], [0], [1], [0, 0, 1, 1], [], []>} : vector<48x9xf32>, vector<9x768xf32>, vector<48x768xf32> -> vector<48x768xf32>
    %cst_4 = arith.constant dense<0.000000e+00> : vector<48xf32>
    %4 = vector.multi_reduction <add>, %3, %cst_4 [1] : vector<48x768xf32> to vector<48xf32>
    %5 = vector.shape_cast %4 : vector<48xf32> to vector<48x1xf32>
    %cst_5 = arith.constant 0.00130208337 : f32
    %6 = vector.broadcast %cst_5 : f32 to vector<48x1xf32>
    %7 = arith.mulf %5, %6 : vector<48x1xf32>
    %8 = vector.broadcast %7 : vector<48x1xf32> to vector<48x768xf32>
    %9 = arith.subf %3, %8 : vector<48x768xf32>
    %10 = arith.mulf %9, %9 : vector<48x768xf32>
    %cst_6 = arith.constant dense<0.000000e+00> : vector<48xf32>
    %11 = vector.multi_reduction <add>, %10, %cst_6 [1] : vector<48x768xf32> to vector<48xf32>
    %12 = vector.shape_cast %11 : vector<48xf32> to vector<48x1xf32>
    %cst_7 = arith.constant 0.00130208337 : f32
    %13 = vector.broadcast %cst_7 : f32 to vector<48x1xf32>
    %14 = arith.mulf %12, %13 : vector<48x1xf32>
    %cst_8 = arith.constant 9.99999974E-6 : f32
    %15 = vector.broadcast %cst_8 : f32 to vector<48x1xf32>
    %16 = arith.addf %14, %15 : vector<48x1xf32>
    %17 = math.rsqrt %16 : vector<48x1xf32>
    %18 = vector.broadcast %17 : vector<48x1xf32> to vector<48x768xf32>
    %19 = arith.mulf %9, %18 : vector<48x768xf32>
    %c0_9 = arith.constant 0 : index
    %c0_10 = arith.constant 0 : index
    %20 = vector.load %arg4[%c0_9, %c0_10] : memref<1x768xf32, #tpu.memory_space<vmem>>, vector<1x768xf32>
    %21 = vector.broadcast %20 : vector<1x768xf32> to vector<48x768xf32>
    %22 = arith.mulf %19, %21 : vector<48x768xf32>
    %c0_11 = arith.constant 0 : index
    %c0_12 = arith.constant 0 : index
    %23 = vector.load %arg5[%c0_11, %c0_12] : memref<48x768xf32, #tpu.memory_space<vmem>>, vector<48x768xf32>
    %24 = arith.addf %22, %23 : vector<48x768xf32>
    %c0_13 = arith.constant 0 : index
    %c0_14 = arith.constant 0 : index
    %c0_15 = arith.constant 0 : index
    %25 = vector.load %arg6[%c0_13, %c0_14, %c0_15] : memref<1x48x768xf32, #tpu.memory_space<vmem>>, vector<1x48x768xf32>
    %26 = vector.shape_cast %25 : vector<1x48x768xf32> to vector<48x768xf32>
    %27 = vector.shape_cast %24 : vector<48x768xf32> to vector<1x48x768xf32>
    tpu.vector_store %arg6[%c0_13, %c0_14, %c0_15], %27 {strides = array<i32>} : memref<1x48x768xf32, #tpu.memory_space<vmem>>, vector<1x48x768xf32>,
    return
  }
  func.func @transform_0(%arg0: i32, %arg1: i32) -> (i32, i32, i32) {
    %c0_i32 = arith.constant 0 : i32
    %c0_i32_0 = arith.constant 0 : i32
    return %arg1, %arg0, %c0_i32 : i32, i32, i32
  }
  func.func @transform_1(%arg0: i32, %arg1: i32) -> (i32, i32) {
    %c0_i32 = arith.constant 0 : i32
    %c0_i32_0 = arith.constant 0 : i32
    %c0_i32_1 = arith.constant 0 : i32
    return %c0_i32, %c0_i32_0 : i32, i32
  }
  func.func @transform_2(%arg0: i32, %arg1: i32) -> (i32, i32) {
    %c0_i32 = arith.constant 0 : i32
    %c0_i32_0 = arith.constant 0 : i32
    %c0_i32_1 = arith.constant 0 : i32
    return %c0_i32, %c0_i32_0 : i32, i32
  }
  func.func @transform_3(%arg0: i32, %arg1: i32) -> (i32, i32) {
    %c0_i32 = arith.constant 0 : i32
    %c0_i32_0 = arith.constant 0 : i32
    return %arg0, %c0_i32 : i32, i32
  }
  func.func @transform_4(%arg0: i32, %arg1: i32) -> (i32, i32, i32) {
    %c0_i32 = arith.constant 0 : i32
    %c0_i32_0 = arith.constant 0 : i32
    return %arg1, %arg0, %c0_i32 : i32, i32, i32
  }
}

</mosaic_0001>

<bundles_post_ra>
// kernel: tpu_custom_call.1
= control target key start
LH: loop header
LB: loop body
LE: loop exit
PB: predicated region body
PF: predicated region fallthrough
CT: control target
= control target key end

     0   :  { %9 = vsyncpa [#allocation3], 0  ;;  %s2066_s0 = inlined_call_operand.vmem [shape: f32[2,48,9], index: 0, kind: input, shape index: {}]   ;;  %s2067_s1 = inlined_call_operand.vmem [shape: f32[9,768], index: 1, kind: input, shape index: {}]   ;;  %s2068_s2 = inlined_call_operand.vmem [shape: f32[1,768], index: 2, kind: input, shape index: {}]   ;;  %s2069_s3 = inlined_call_operand.hbm [shape: f32[48,768], index: 3, kind: input, shape index: {}]   ;;  %s2070_s4 = inlined_call_operand.hbm [shape: f32[2,48,768], index: 4, kind: output, shape index: {}]  }
   0x1   :  { %10 = vsyncpa [#allocation4], 0 }
   0x2   :  { %12 = vsyncpa [#allocation4 + $0x1], 0  ;;  %s1400_s15 = smov 0   ;;  %s1402_s16 = smov 0  }
   0x3   :  { %s1404_s17 = smov 0   ;;  %s1406_s18 = smov 0  }
   0x4   :  { %s1408_s19 = smov 0   ;;  %s1410_s20 = smov 0  }
   0x5 LB: > { %s1113_s21 = sadd.s32 4294967295, %s1365_s20   ;;  %s1114_s22 = sadd.s32 4294967294, %s1365_s20   ;;  %s1365_s20 = sphi %s1410_s20, %s18_s20   ;;  %s1361_s19 = sphi %s1408_s19, %s2090_s19   ;;  %s1357_s18 = sphi %s1406_s18, %s2089_s18   ;;  %s1353_s17 = sphi %s1404_s17, %s2088_s17   ;;  %s1349_s16 = sphi %s1402_s16, %s2087_s16   ;;  %s1345_s15 = sphi %s1400_s15, %s2086_s15  }
   0x6   : > { %s27_s23 = sadd.s32 1, %s1361_s19  ;;  %s135_s24 = sadd.s32 1, %s1353_s17 }
   0x7   : > { %p28_p0 = scmp.ge.s32.totalorder %s27_s23, 2  ;;  %p145_p1 = scmp.ne.s32.totalorder %s1353_s17, %s1349_s16 }
   0x8   : > { %p146_p2 = scmp.eq.s32.totalorder %s1113_s21, 1  ;;  %p151_p3 = scmp.ne.s32.totalorder %s1349_s16, %s1345_s15 }
   0x9   : > { %s2092_s23 = smov (%p28_p0, %s27_s23), 0  ;;  %p152_p5 = scmp.eq.s32.totalorder %s1114_s22, 1 }
   0xa   : > { %p1440_p4 = por %p146_p2, %p145_p1  ;;  %s130_s26 = ssub.s32 %s1361_s19, %s2092_s23 }
   0xb   : > { %p1115_p6 = scmp.ge.s32.totalorder %s1365_s20, 1  ;;  %p133_p7 = scmp.eq.s32.totalorder %s130_s26, 0 }
   0xc   : > { %s2075_s25 = scalar_select %p1440_p4, 1, 0 }
   0xd   : > { %p1447_p8 = por %p152_p5, %p151_p3  ;;  %p159_p9 = scmp.lt.s32.totalorder %s1365_s20, 3 }
   0xe   : > { %s1453_s28 = scalar_select %p133_p7, %s1353_s17, %s135_s24  }
   0xf   : > { %s2076_s27 = scalar_select %p1447_p8, 1, 0 }
  0x10   : > { %p1455_p10 = pnand %p1115_p6, %p159_p9  ;;  %p1459_p11 = scmp.eq.s32.totalorder %s1113_s21, 0 }
  0x11   : > { %s1367_s5 = smov [#allocation2]   ;;  %s1255_s10 = scalar_lea.hbm %s2069_s3, 4608 }
  0x12   : > { %s2077_s29 = scalar_select %p1455_p10, 1, 0 }
  0x13   : > { %s2078_s30 = scalar_select %p1459_p11, 1, 0 }
  0x14   : > { %p1177_p12 = pneg %p1455_p10  ;;  %s181_s6 = sshll.u32 %s1367_s5, 4  ;;  %s182_s6 = int_to_ptr.vmem [resolvable:$true] %s181_s6 }
  0x15   : > { %p1256_p0 = scmp.ne.s32.totalorder %s2069_s3, %s1255_s10  ;;  %p1262_p5 = scmp.lt.u32.totalorder %s1255_s10, %s2069_s3 }
  0x16   : > { %p1467_p13 = pnand %p1459_p11, %p1177_p12 }
  0x18   : > { %p1257_p1 = pneg %p1467_p13 }
  0x1a   : > { %p1258_p2 = pnand %p1257_p1, %p1256_p0 }
  0x1c   : > { %p1259_p3 = pneg %p1258_p2 }
  0x1e   : > { %p1264_p6 = pnand %p1262_p5, %p1259_p3 }
  0x20   : > { %1267 = shalt.err (!%p1264_p6)
}
  0x21   : > { %s1268_s21 = scalar_lea.vmem %s182_s6, 4608  ;;  %p1276_p8 = scmp.lt.s32.totalorder %s182_s6, %s182_s6 }
  0x22   : > { %p1269_p7 = scmp.ne.s32.totalorder %s182_s6, %s1268_s21  ;;  %p1277_p4 = scmp.lt.s32.totalorder %s1268_s21, %s1268_s21 }
  0x24   : > { %p1271_p9 = pnand %p1269_p7, %p1257_p1  ;;  %p1278_p11 = por %p1277_p4, %p1276_p8 }
  0x26   : > { %p1272_p12 = pneg %p1271_p9 }
  0x28   : > { %p1279_p10 = pnand %p1278_p11, %p1272_p12 }
  0x2a   : > { %1282 = shalt.err (!%p1279_p10)
}
  0x2b   : > { %s1368_s22 = smov 768   ;;  %s1369_s24 = smov 48  }
  0x2c   : > { %1180 = dma.hbm_to_vmem [thread:$0]  (!%p1467_p13), %s2069_s3, 4608, %s182_s6, [#allocation3], %s1368_s22, %s1368_s22, %s1369_s24  }
  0x2d   : > { %p2080_p0 = scmp.ne.s32.totalorder %s2077_s29, 0 }
  0x2e   : > { %p2081_p2 = scmp.ne.s32.totalorder (!%p2080_p0), %s2078_s30, 0 }
  0x2f   : > { %210 = sbr.rel (%p2080_p0) target bundleno = 659 (0x293), region = 36 }
  0x36   : > { %1336 = dma.done.wait (%p2081_p2), [#allocation3], 4608  }
  0x37   : > { %1338 = vsyncadd (%p2081_p2), [#allocation3], 4294962688  ;;  %p241_p4 = scmp.lt.s32.totalorder %s1357_s18, 1  ;;  %v1370_v0 = vmov 0.0   ;;  %vm289_vm0 = vcmask 1040384   ;;  %vm1371_vm1 = vmmov 1  }
  0x38   : > { %390 = vmatprep.mubr.f32.mxu1 %v1370_v0  ;;  %372 = vmatprep.mubr.f32.mxu0 %v1370_v0  ;;  %vm1497_vm2 = vmpackc.low %vm289_vm0, %vm1371_vm1  ;;  %v259_v2 = vld [vmem:[%s2067_s1 + $0x8] sm:$0xff]  ;;  %v265_v3 = vld [vmem:[%s2067_s1 + $0x38] sm:$0x1]  ;;  %vm270_vm3 = vcmask 72704   ;;  %s237_s5 = sand.u32 1, %s1349_s16   ;;  %s1170_s8 = smul.u32 4608, %s1357_s18 }
  0x39   : > { %s242_s7 = scalar_select %p241_p4, %s1357_s18, 1  ;;  %v258_v4 = vld [vmem:[%s2067_s1] sm:$0xff]  ;;  %v1148_v5 = vpack.c.bf16 %v265_v3, %v259_v2  ;;  %v264_v6 = vld [vmem:[%s2067_s1 + $0x30] sm:$0x1]  ;;  %v261_v7 = vld [vmem:[%s2067_s1 + $0x18] sm:$0xff] }
  0x3a   : > { %v1151_v8 = vpack.c.bf16 %v264_v6, %v258_v4  ;;  %v267_v9 = vld [vmem:[%s2067_s1 + $0x48] sm:$0x1]  ;;  %v260_v10 = vld [vmem:[%s2067_s1 + $0x10] sm:$0xff]  ;;  %v266_v11 = vld [vmem:[%s2067_s1 + $0x40] sm:$0x1]  ;;  %s2008_s9 = scalar_lea.hbm %s2070_s4, %s1170_s8  ;;  %s2020_s10 = scalar_lea.sflag [#allocation4], %s237_s5 }
  0x3b   : > { %s1169_s6 = smul.u32 48, %s242_s7  ;;  %1166 = vmatprep.subr.msk.bf16.mxu1 %vm1497_vm2, %v1148_v5  ;;  %1150 = vmatprep.subr.msk.bf16.mxu0 %vm1497_vm2, %v1148_v5  ;;  %v1154_v13 = vpack.c.bf16 %v267_v9, %v261_v7  ;;  %v263_v15 = vld [vmem:[%s2067_s1 + $0x28] sm:$0xff]  ;;  %v1157_v16 = vpack.c.bf16 %v266_v11, %v260_v10  ;;  %v269_v17 = vld [vmem:[%s2067_s1 + $0x58] sm:$0x1]  ;;  %v262_v18 = vld [vmem:[%s2067_s1 + $0x20] sm:$0xff]  ;;  %p2084_p10 = scmp.ne.s32.totalorder %s2075_s25, 0 }
  0x3c   : > { %1167 = vmatpush1.bf16.msk.msra.mxu1 %vm1497_vm2, %v1151_v8  ;;  %1153 = vmatpush1.bf16.msk.msra.mxu0 %vm1497_vm2, %v1151_v8  ;;  %v268_v19 = vld [vmem:[%s2067_s1 + $0x50] sm:$0x1]  ;;  %v1160_v20 = vpack.c.bf16 %v269_v17, %v263_v15  ;;  %s1892_s7 = smul.u32 288, %s237_s5  ;;  %s1372_s12 = smov [#allocation5]  }
  0x3d   : > { %s1513_s14 = scalar_lea.vmem %s2066_s0, %s1169_s6  ;;  %1156 = vmatprep.subr.msk.bf16.mxu1 %vm1497_vm2, %v1154_v13  ;;  %v1163_v21 = vpack.c.bf16 %v268_v19, %v262_v18  ;;  %s1287_s13 = sshll.u32 %s1372_s12, 4  ;;  %s1288_s13 = int_to_ptr.vmem [resolvable:$false] %s1287_s13 }
  0x3e   : > { %v255_v12 = vld [vmem:[%s1513_s14 + $0x18] sm:$0xff]  ;;  %v252_v14 = vld [vmem:[%s1513_s14] sm:$0xff]  ;;  %v253_v23 = vld [vmem:[%s1513_s14 + $0x8] sm:$0xff]  ;;  %1162 = vmatprep.subr.msk.bf16.mxu0 %vm1497_vm2, %v1160_v20  ;;  %s1913_s29 = scalar_lea.vmem [#allocation5], %s1892_s7  ;;  %s1289_s21 = scalar_lea.vmem %s1288_s13, 9216 }
  0x3f   : > { %1126 = vmatmul.mubr.msk.f32.vlgmr.msra.gmra.mrb[0].mxu1 %vm270_vm3, %v255_v12  ;;  %1123 = vmatmul.mubr.msk.f32.vlgmr.msra.gmra.mrb[0].mxu0 %vm270_vm3, %v252_v14  ;;  %v256_v22 = vld [vmem:[%s1513_s14 + $0x20] sm:$0xff]  ;;  %v257_v24 = vld [vmem:[%s1513_s14 + $0x28] sm:$0xff]  ;;  %v254_v25 = vld [vmem:[%s1513_s14 + $0x10] sm:$0xff]  ;;  %s1020_s6 = sshll.u32 %s1913_s29, 4  ;;  %s2010_s6 = int_to_ptr.vmem [resolvable:$true] %s1020_s6 }
  0x40   : > { %1159 = vmatpush1.bf16.msk.msra.mxu1 %vm1497_vm2, %v1157_v16  ;;  %396 = vmatprep.mubr.f32.mxu1 %v1370_v0  ;;  %s1283_s11 = scalar_lea.vmem %s2010_s6, 4608  ;;  %p1290_p1 = scmp.lt.s32.totalorder %s2010_s6, %s1288_s13 }
  0x41   : > { %378 = vmatprep.mubr.f32.mxu0 %v1370_v0  ;;  %1165 = vmatpush1.bf16.msk.msra.mxu0 %vm1497_vm2, %v1163_v21  ;;  %p1284_p8 = scmp.ne.s32.totalorder %s2010_s6, %s1283_s11  ;;  %p1291_p3 = scmp.lt.s32.totalorder %s1289_s21, %s1283_s11 }
  0x43   : > { %1127 = vmatmul.mubr.msk.f32.gmra.mrb[2].mxu1 %vm270_vm3, %v256_v22  ;;  %1124 = vmatmul.mubr.msk.f32.gmra.mrb[2].mxu0 %vm270_vm3, %v253_v23  ;;  %p1285_p11 = pnand %p1284_p8, %p2084_p10  ;;  %p1292_p5 = por %p1291_p3, %p1290_p1 }
  0x44   : > { %402 = vmatprep.mubr.f32.mxu1 %v1370_v0  ;;  %384 = vmatprep.mubr.f32.mxu0 %v1370_v0 }
  0x45   : > { %p1286_p13 = pneg %p1285_p11 }
  0x47   : > { %1128 = vmatmul.mubr.msk.f32.gmra.mrb[4].mxu1 %vm270_vm3, %v257_v24  ;;  %1125 = vmatmul.mubr.msk.f32.gmra.mrb[4].mxu0 %vm270_vm3, %v254_v25  ;;  %p1293_p6 = pnand %p1292_p5, %p1286_p13 }
  0x48   : > { %473 = vmatprep.mubr.f32.mxu1 %v1370_v0  ;;  %574 = vmatprep.mubr.f32.mxu0 %v1370_v0 }
  0x4b   : > { %1131 = vmatmul.mubr.msk.f32.vlgmr.msra.gmra.mrb[6].mxu1 %vm270_vm3, %v252_v14  ;;  %1139 = vmatmul.mubr.msk.f32.vlgmr.msra.gmra.mrb[6].mxu0 %vm270_vm3, %v252_v14 }
  0x4c   : > { %479 = vmatprep.mubr.f32.mxu1 %v1370_v0  ;;  %580 = vmatprep.mubr.f32.mxu0 %v1370_v0 }
  0x4f   : > { %1132 = vmatmul.mubr.msk.f32.gmra.mrb[8].mxu1 %vm270_vm3, %v253_v23  ;;  %1140 = vmatmul.mubr.msk.f32.gmra.mrb[8].mxu0 %vm270_vm3, %v253_v23 }
  0x50   : > { %485 = vmatprep.mubr.f32.mxu1 %v1370_v0  ;;  %586 = vmatprep.mubr.f32.mxu0 %v1370_v0 }
  0x53   : > { %1133 = vmatmul.mubr.msk.f32.gmra.mrb[10].mxu1 %vm270_vm3, %v254_v25  ;;  %1141 = vmatmul.mubr.msk.f32.gmra.mrb[10].mxu0 %vm270_vm3, %v254_v25 }
  0x54   : > { %491 = vmatprep.mubr.f32.mxu1 %v1370_v0  ;;  %592 = vmatprep.mubr.f32.mxu0 %v1370_v0 }
  0x57   : > { %1134 = vmatmul.mubr.msk.f32.gmra.mrb[12].mxu1 %vm270_vm3, %v255_v12  ;;  %1142 = vmatmul.mubr.msk.f32.gmra.mrb[12].mxu0 %vm270_vm3, %v255_v12 }
  0x58   : > { %497 = vmatprep.mubr.f32.mxu1 %v1370_v0  ;;  %598 = vmatprep.mubr.f32.mxu0 %v1370_v0 }
  0x5b   : > { %1135 = vmatmul.mubr.msk.f32.gmra.mrb[14].mxu1 %vm270_vm3, %v256_v22  ;;  %1143 = vmatmul.mubr.msk.f32.gmra.mrb[14].mxu0 %vm270_vm3, %v256_v22 }
  0x5c   : > { %503 = vmatprep.mubr.f32.mxu1 %v1370_v0  ;;  %604 = vmatprep.mubr.f32.mxu0 %v1370_v0 }
  0x5f   : > { %1136 = vmatmul.mubr.msk.f32.gmra.mrb[16].mxu1 %vm270_vm3, %v257_v24  ;;  %1144 = vmatmul.mubr.msk.f32.gmra.mrb[16].mxu0 %vm270_vm3, %v257_v24 }
 0x112   : > { %v1598_v26 = vpop.f32.mrb[0].mxu1  ;;  %v1600_v27 = vpop.f32.mrb[0].mxu0 }
 0x113   : > { %v1602_v28 = vpop.f32.mrb[1].mxu1  ;;  %v1604_v29 = vpop.f32.mrb[1].mxu0 }
 0x114   : > { %v632_v30 = vadd.f32 %v1602_v28, %v1598_v26  ;;  %v611_v31 = vadd.f32 %v1604_v29, %v1600_v27 }
 0x116   : > { %v1610_v32 = vpop.f32.mrb[2].mxu1  ;;  %v1612_v33 = vpop.f32.mrb[2].mxu0 }
 0x117   : > { %v1614_v34 = vpop.f32.mrb[3].mxu1  ;;  %v1616_v35 = vpop.f32.mrb[3].mxu0 }
 0x118   : > { %v639_v36 = vadd.f32 %v1614_v34, %v1610_v32  ;;  %v618_v37 = vadd.f32 %v1616_v35, %v1612_v33 }
 0x11a   : > { %v1622_v38 = vpop.f32.mrb[4].mxu1  ;;  %v1624_v39 = vpop.f32.mrb[4].mxu0 }
 0x11b   : > { %v1626_v40 = vpop.f32.mrb[5].mxu1  ;;  %v1628_v41 = vpop.f32.mrb[5].mxu0 }
 0x11c   : > { %v646_v42 = vadd.f32 %v1626_v40, %v1622_v38  ;;  %v625_v43 = vadd.f32 %v1628_v41, %v1624_v39 }
 0x11e   : > { %v475_v44 = vpop.f32.mrb[6].mxu1  ;;  %v1634_v45 = vpop.f32.mrb[6].mxu0 }
 0x11f   : > { %v612_v46 = vadd.f32 %v611_v31, %v475_v44  ;;  %v477_v47 = vpop.f32.mrb[7].mxu1  ;;  %v1636_v48 = vpop.f32.mrb[7].mxu0 }
 0x121   : > { %v613_v49 = vadd.f32 %v612_v46, %v477_v47 }
 0x122   : > { %v1638_v50 = vpop.f32.mrb[8].mxu1  ;;  %v1640_v51 = vpop.f32.mrb[8].mxu0 }
 0x123   : > { %v619_v52 = vadd.f32 %v618_v37, %v1638_v50  ;;  %v614_v53 = vadd.f32 %v613_v49, %v1634_v45  ;;  %v1644_v54 = vpop.f32.mrb[9].mxu1  ;;  %v1646_v55 = vpop.f32.mrb[9].mxu0 }
 0x125   : > { %v620_v56 = vadd.f32 %v619_v52, %v1644_v54  ;;  %v615_v57 = vadd.f32 %v614_v53, %v1636_v48 }
 0x126   : > { %v1650_v58 = vpop.f32.mrb[10].mxu1  ;;  %v1652_v59 = vpop.f32.mrb[10].mxu0 }
 0x127   : > { %v626_v60 = vadd.f32 %v625_v43, %v1650_v58  ;;  %v621_v61 = vadd.f32 %v620_v56, %v1640_v51  ;;  %v1656_v62 = vpop.f32.mrb[11].mxu1  ;;  %616 = vadd.xlane.f32.xlu0 %v615_v57  ;;  %v1658_v63 = vpop.f32.mrb[11].mxu0 }
 0x129   : > { %v627_v0 = vadd.f32 %v626_v60, %v1656_v62  ;;  %v622_v1 = vadd.f32 %v621_v61, %v1646_v55 }
 0x12a   : > { %v1662_v2 = vpop.f32.mrb[12].mxu1  ;;  %v1664_v3 = vpop.f32.mrb[12].mxu0 }
 0x12b   : > { %v633_v4 = vadd.f32 %v632_v30, %v1662_v2  ;;  %v628_v5 = vadd.f32 %v627_v0, %v1652_v59  ;;  %v1668_v6 = vpop.f32.mrb[13].mxu1  ;;  %623 = vadd.xlane.f32.xlu0 %v622_v1  ;;  %v1670_v7 = vpop.f32.mrb[13].mxu0 }
 0x12d   : > { %v634_v8 = vadd.f32 %v633_v4, %v1668_v6  ;;  %v629_v9 = vadd.f32 %v628_v5, %v1658_v63 }
 0x12e   : > { %v1674_v10 = vpop.f32.mrb[14].mxu1  ;;  %v1676_v11 = vpop.f32.mrb[14].mxu0 }
 0x12f   : > { %v640_v12 = vadd.f32 %v639_v36, %v1674_v10  ;;  %v635_v13 = vadd.f32 %v634_v8, %v1664_v3  ;;  %v1680_v14 = vpop.f32.mrb[15].mxu1  ;;  %630 = vadd.xlane.f32.xlu1 %v629_v9  ;;  %v1682_v15 = vpop.f32.mrb[15].mxu0 }
 0x131   : > { %v641_v16 = vadd.f32 %v640_v12, %v1680_v14  ;;  %v636_v17 = vadd.f32 %v635_v13, %v1670_v7 }
 0x132   : > { %v1686_v18 = vpop.f32.mrb[16].mxu1  ;;  %v1688_v19 = vpop.f32.mrb[16].mxu0 }
 0x133   : > { %v647_v20 = vadd.f32 %v646_v42, %v1686_v18  ;;  %v642_v21 = vadd.f32 %v641_v16, %v1676_v11  ;;  %v1692_v22 = vpop.f32.mrb[17].mxu1  ;;  %637 = vadd.xlane.f32.xlu1 %v636_v17  ;;  %v1694_v23 = vpop.f32.mrb[17].mxu0 }
 0x135   : > { %v648_v24 = vadd.f32 %v647_v20, %v1692_v22  ;;  %v643_v25 = vadd.f32 %v642_v21, %v1682_v15 }
 0x137   : > { %v649_v30 = vadd.f32 %v648_v24, %v1688_v19  ;;  %644 = vadd.xlane.f32.xlu0 %v643_v25 }
 0x139   : > { %v650_v31 = vadd.f32 %v649_v30, %v1694_v23 }
 0x13b   : > { %651 = vadd.xlane.f32.xlu1 %v650_v31 }
 0x1b4   : > { %v617_v36 = vpop.xlane.xlu0 %616 }
 0x1b5   : > { %v653_v37 = vmul.f32 0.0013020834, %v617_v36 }
 0x1b7   : > { %v1701_v42 = vsub.f32 %v1600_v27, %v653_v37  ;;  %v1704_v43 = vsub.f32 %v1604_v29, %v653_v37  ;;  %v1706_v46 = vsub.f32 %v475_v44, %v653_v37  ;;  %v1708_v52 = vsub.f32 %v477_v47, %v653_v37 }
 0x1b8   : > { %v624_v49 = vpop.xlane.xlu0 %623  ;;  %v1715_v60 = vsub.f32 %v1634_v45, %v653_v37  ;;  %v1729_v1 = vsub.f32 %v1636_v48, %v653_v37 }
 0x1b9   : > { %v654_v53 = vmul.f32 0.0013020834, %v624_v49  ;;  %v695_v56 = vmul.f32 %v1701_v42, %v1701_v42  ;;  %v696_v57 = vmul.f32 %v1704_v43, %v1704_v43  ;;  %v697_v27 = vmul.f32 %v1706_v46, %v1706_v46 }
 0x1ba   : > { %v698_v45 = vmul.f32 %v1708_v52, %v1708_v52  ;;  %v700_v21 = vmul.f32 %v1729_v1, %v1729_v1 }
 0x1bb   : > { %v731_v29 = vadd.f32 %v696_v57, %v695_v56  ;;  %v1720_v44 = vsub.f32 %v1612_v33, %v654_v53  ;;  %v1723_v47 = vsub.f32 %v1616_v35, %v654_v53  ;;  %v1726_v61 = vsub.f32 %v1638_v50, %v654_v53 }
 0x1bc   : > { %v631_v0 = vpop.xlane.xlu1 %630  ;;  %v1734_v4 = vsub.f32 %v1644_v54, %v654_v53  ;;  %v699_v50 = vmul.f32 %v1715_v60, %v1715_v60  ;;  %v1743_v48 = vsub.f32 %v1640_v51, %v654_v53  ;;  %v1746_v9 = vsub.f32 %v1646_v55, %v654_v53 }
 0x1bd   : > { %v655_v5 = vmul.f32 0.0013020834, %v631_v0  ;;  %v732_v8 = vadd.f32 %v731_v29, %v697_v27  ;;  %v701_v33 = vmul.f32 %v1720_v44, %v1720_v44  ;;  %v702_v35 = vmul.f32 %v1723_v47, %v1723_v47 }
 0x1be   : > { %v703_v54 = vmul.f32 %v1726_v61, %v1726_v61  ;;  %v704_v51 = vmul.f32 %v1734_v4, %v1734_v4  ;;  %v705_v31 = vmul.f32 %v1743_v48, %v1743_v48  ;;  %v706_v36 = vmul.f32 %v1746_v9, %v1746_v9 }
 0x1bf   : > { %v733_v12 = vadd.f32 %v732_v8, %v698_v45  ;;  %v738_v13 = vadd.f32 %v702_v35, %v701_v33  ;;  %v1751_v16 = vsub.f32 %v1624_v39, %v655_v5  ;;  %v1754_v17 = vsub.f32 %v1628_v41, %v655_v5 }
 0x1c0   : > { %v638_v20 = vpop.xlane.xlu1 %637  ;;  %v1761_v55 = vsub.f32 %v1650_v58, %v655_v5  ;;  %v1764_v24 = vsub.f32 %v1656_v62, %v655_v5  ;;  %v1775_v62 = vsub.f32 %v1652_v59, %v655_v5  ;;  %v1789_v59 = vsub.f32 %v1658_v63, %v655_v5 }
 0x1c1   : > { %v656_v25 = vmul.f32 0.0013020834, %v638_v20  ;;  %v734_v30 = vadd.f32 %v733_v12, %v699_v50  ;;  %v739_v39 = vadd.f32 %v738_v13, %v703_v54  ;;  %v707_v41 = vmul.f32 %v1751_v16, %v1751_v16 }
 0x1c2   : > { %v708_v37 = vmul.f32 %v1754_v17, %v1754_v17  ;;  %v709_v57 = vmul.f32 %v1761_v55, %v1761_v55  ;;  %v711_v54 = vmul.f32 %v1775_v62, %v1775_v62 }
 0x1c3   : > { %v735_v58 = vadd.f32 %v734_v30, %v700_v21  ;;  %v740_v49 = vadd.f32 %v739_v39, %v704_v51  ;;  %v1778_v53 = vsub.f32 %v1598_v26, %v656_v25  ;;  %v1783_v29 = vsub.f32 %v1602_v28, %v656_v25 }
 0x1c4   : > { %v645_v56 = vpop.xlane.xlu0 %644  ;;  %v745_v27 = vadd.f32 %v708_v37, %v707_v41  ;;  %v1786_v0 = vsub.f32 %v1662_v2, %v656_v25  ;;  %v710_v26 = vmul.f32 %v1764_v24, %v1764_v24  ;;  %v1794_v35 = vsub.f32 %v1668_v6, %v656_v25 }
 0x1c5   : > { %v657_v45 = vmul.f32 0.0013020834, %v645_v56  ;;  %736 = vadd.xlane.f32.xlu0 %v735_v58  ;;  %v741_v8 = vadd.f32 %v740_v49, %v705_v31  ;;  %v713_v28 = vmul.f32 %v1778_v53, %v1778_v53  ;;  %v714_v2 = vmul.f32 %v1783_v29, %v1783_v29 }
 0x1c6   : > { %v746_v33 = vadd.f32 %v745_v27, %v709_v57  ;;  %v1803_v63 = vsub.f32 %v1664_v3, %v656_v25  ;;  %v715_v5 = vmul.f32 %v1786_v0, %v1786_v0  ;;  %v712_v30 = vmul.f32 %v1789_v59, %v1789_v59 }
 0x1c7   : > { %v742_v50 = vadd.f32 %v741_v8, %v706_v36  ;;  %v752_v6 = vadd.f32 %v714_v2, %v713_v28  ;;  %v1808_v20 = vsub.f32 %v1610_v32, %v657_v45  ;;  %v1811_v21 = vsub.f32 %v1614_v34, %v657_v45 }
 0x1c8   : > { %v652_v12 = vpop.xlane.xlu1 %651  ;;  %v747_v13 = vadd.f32 %v746_v33, %v710_v26  ;;  %v1816_v3 = vsub.f32 %v1670_v7, %v656_v25  ;;  %v1819_v39 = vsub.f32 %v1674_v10, %v657_v45  ;;  %v716_v31 = vmul.f32 %v1794_v35, %v1794_v35 }
 0x1c9   : > { %v658_v51 = vmul.f32 0.0013020834, %v652_v12  ;;  %743 = vadd.xlane.f32.xlu1 %v742_v50  ;;  %v753_v32 = vadd.f32 %v752_v6, %v715_v5  ;;  %v719_v34 = vmul.f32 %v1808_v20, %v1808_v20  ;;  %v717_v36 = vmul.f32 %v1803_v63, %v1803_v63 }
 0x1ca   : > { %v748_v41 = vadd.f32 %v747_v13, %v711_v54  ;;  %v1828_v37 = vsub.f32 %v1680_v14, %v657_v45  ;;  %v720_v7 = vmul.f32 %v1811_v21, %v1811_v21  ;;  %v1833_v58 = vsub.f32 %v1676_v11, %v657_v45 }
 0x1cb   : > { %v754_v10 = vadd.f32 %v753_v32, %v716_v31  ;;  %v1836_v49 = vsub.f32 %v1622_v38, %v658_v51  ;;  %v721_v56 = vmul.f32 %v1819_v39, %v1819_v39  ;;  %v1841_v27 = vsub.f32 %v1626_v40, %v658_v51 }
 0x1cc   : > { %v749_v25 = vadd.f32 %v748_v41, %v712_v30  ;;  %v759_v57 = vadd.f32 %v720_v7, %v719_v34  ;;  %v1844_v14 = vsub.f32 %v1686_v18, %v658_v51  ;;  %v718_v8 = vmul.f32 %v1816_v3, %v1816_v3 }
 0x1cd   : > { %v755_v26 = vadd.f32 %v754_v10, %v717_v36  ;;  %v1849_v11 = vsub.f32 %v1682_v15, %v657_v45  ;;  %v725_v38 = vmul.f32 %v1836_v49, %v1836_v49  ;;  %v722_v33 = vmul.f32 %v1828_v37, %v1828_v37 }
 0x1ce   : > { %750 = vadd.xlane.f32.xlu0 %v749_v25  ;;  %v760_v28 = vadd.f32 %v759_v57, %v721_v56  ;;  %v1856_v40 = vsub.f32 %v1692_v22, %v658_v51  ;;  %v726_v18 = vmul.f32 %v1841_v27, %v1841_v27  ;;  %v723_v50 = vmul.f32 %v1833_v58, %v1833_v58 }
 0x1cf   : > { %v756_v2 = vadd.f32 %v755_v26, %v718_v8  ;;  %v1863_v15 = vsub.f32 %v1688_v19, %v658_v51  ;;  %v727_v45 = vmul.f32 %v1844_v14, %v1844_v14  ;;  %v724_v22 = vmul.f32 %v1849_v11, %v1849_v11 }
 0x1d0   : > { %v761_v54 = vadd.f32 %v760_v28, %v722_v33  ;;  %v766_v5 = vadd.f32 %v726_v18, %v725_v38  ;;  %v1870_v13 = vsub.f32 %v1694_v23, %v658_v51  ;;  %v728_v6 = vmul.f32 %v1856_v40, %v1856_v40  ;;  %v827_v28 = vld [vmem:[%s2068_s2] sm:$0x3f] }
 0x1d1   : > { %757 = vadd.xlane.f32.xlu1 %v756_v2  ;;  %v729_v19 = vmul.f32 %v1863_v15, %v1863_v15  ;;  %v829_v25 = vlaneseq }
 0x1d2   : > { %v762_v12 = vadd.f32 %v761_v54, %v723_v50  ;;  %v767_v30 = vadd.f32 %v766_v5, %v727_v45  ;;  %v730_v32 = vmul.f32 %v1870_v13, %v1870_v13 }
 0x1d3   : > { %v830_v56 = vshrl.u32 %v829_v25, 7 }
 0x1d4   : > { %v763_v41 = vadd.f32 %v762_v12, %v724_v22  ;;  %v768_v31 = vadd.f32 %v767_v30, %v728_v6 }
 0x1d5   : > { %v831_v26 = vsub.s32 0, %v830_v56  ;;  %v835_v38 = vsub.s32 1, %v830_v56  ;;  %v839_v18 = vsub.s32 2, %v830_v56  ;;  %v843_v2 = vsub.s32 3, %v830_v56 }
 0x1d6   : > { %764 = vadd.xlane.f32.xlu0 %v763_v41  ;;  %v769_v34 = vadd.f32 %v768_v31, %v729_v19  ;;  %v847_v54 = vsub.s32 4, %v830_v56  ;;  %v851_v45 = vsub.s32 5, %v830_v56  ;;  %v897_v56 = vld [vmem:[#allocation2 + $0x10] sm:$0xff] }
 0x1d7   : > { %v1882_v22 = vrot.slane %v827_v28, %v831_v26  ;;  %v1884_v12 = vrot.slane %v827_v28, %v835_v38  ;;  %v1886_v30 = vrot.slane %v827_v28, %v839_v18  ;;  %v1888_v41 = vrot.slane %v827_v28, %v843_v2 }
 0x1d8   : > { %v770_v36 = vadd.f32 %v769_v34, %v730_v32  ;;  %v1894_v32 = vrot.slane %v827_v28, %v847_v54  ;;  %v1896_v34 = vrot.slane %v827_v28, %v851_v45  ;;  %v900_v28 = vld [vmem:[#allocation2 + $0x28] sm:$0xff] }
 0x1da   : > { %771 = vadd.xlane.f32.xlu1 %v770_v36  ;;  %v895_v36 = vld [vmem:[#allocation2] sm:$0xff] }
 0x252   : > { %v737_v7 = vpop.xlane.xlu0 %736 }
 0x253   : > { %v773_v23 = vmul.f32 0.0013020834, %v737_v7 }
 0x255   : > { %v779_v51 = vadd.f32 1e-05, %v773_v23 }
 0x256   : > { %v744_v10 = vpop.xlane.xlu1 %743 }
 0x257   : > { %1243 = vrsqrt.f32 %v779_v51  ;;  %v774_v57 = vmul.f32 0.0013020834, %v744_v10  ;;  %v896_v10 = vld [vmem:[#allocation2 + $0x8] sm:$0xff] }
 0x259   : > { %v780_v8 = vadd.f32 1e-05, %v774_v57  ;;  %v898_v57 = vld [vmem:[#allocation2 + $0x18] sm:$0xff] }
 0x25b   : > { %1245 = vrsqrt.f32 %v780_v8  ;;  %v751_v33 = vpop.xlane.xlu0 %750 }
 0x25c   : > { %v775_v50 = vmul.f32 0.0013020834, %v751_v33  ;;  %v899_v33 = vld [vmem:[#allocation2 + $0x20] sm:$0xff] }
 0x25e   : > { %v781_v5 = vadd.f32 1e-05, %v775_v50  ;;  %v758_v6 = vpop.xlane.xlu1 %757 }
 0x25f   : > { %v776_v19 = vmul.f32 0.0013020834, %v758_v6 }
 0x260   : > { %1247 = vrsqrt.f32 %v781_v5 }
 0x261   : > { %v1244_v31 = vpop.eup %1243  ;;  %v782_v38 = vadd.f32 1e-05, %v776_v19 }
 0x262   : > { %v791_v7 = vmul.f32 %v1244_v31, %v1701_v42  ;;  %v792_v25 = vmul.f32 %v1244_v31, %v1704_v43  ;;  %v793_v23 = vmul.f32 %v1244_v31, %v1706_v46  ;;  %v794_v51 = vmul.f32 %v1244_v31, %v1708_v52 }
 0x263   : > { %v795_v8 = vmul.f32 %v1244_v31, %v1715_v60  ;;  %v796_v26 = vmul.f32 %v1244_v31, %v1729_v1  ;;  %v765_v52 = vpop.xlane.xlu0 %764  ;;  %1249 = vrsqrt.f32 %v782_v38  ;;  %v906_v38 = vld [vmem:[#allocation2 + $0x58] sm:$0xff] }
 0x264   : > { %v859_v18 = vmul.f32 %v1882_v22, %v791_v7  ;;  %v860_v42 = vmul.f32 %v1884_v12, %v792_v25  ;;  %v861_v43 = vmul.f32 %v1886_v30, %v793_v23  ;;  %v862_v46 = vmul.f32 %v1888_v41, %v794_v51  ;;  %v901_v7 = vld [vmem:[#allocation2 + $0x30] sm:$0xff]  ;;  %v903_v51 = vld [vmem:[#allocation2 + $0x40] sm:$0xff] }
 0x265   : > { %v1246_v2 = vpop.eup %1245  ;;  %v863_v50 = vmul.f32 %v1894_v32, %v795_v8  ;;  %v864_v60 = vmul.f32 %v1896_v34, %v796_v26  ;;  %v777_v1 = vmul.f32 0.0013020834, %v765_v52  ;;  %v905_v26 = vld [vmem:[#allocation2 + $0x50] sm:$0xff] }
 0x266   : > { %v931_v54 = vadd.f32 %v895_v36, %v859_v18  ;;  %v932_v45 = vadd.f32 %v896_v10, %v860_v42  ;;  %v933_v5 = vadd.f32 %v897_v56, %v861_v43  ;;  %v934_v6 = vadd.f32 %v898_v57, %v862_v46  ;;  %v902_v36 = vld [vmem:[#allocation2 + $0x38] sm:$0xff]  ;;  %v904_v10 = vld [vmem:[#allocation2 + $0x48] sm:$0xff] }
 0x267   : > { %v935_v19 = vadd.f32 %v899_v33, %v863_v50  ;;  %v936_v31 = vadd.f32 %v900_v28, %v864_v60  ;;  %v797_v25 = vmul.f32 %v1246_v2, %v1720_v44  ;;  %v798_v23 = vmul.f32 %v1246_v2, %v1723_v47  ;;  %v772_v8 = vpop.xlane.xlu1 %771 }
 0x268   : > { %967 = vst [vmem:[%s1913_s29] sm:$0xff] %v931_v54  ;;  %968 = vst [vmem:[%s1913_s29 + $0x8] sm:$0xff] %v932_v45  ;;  %v799_v56 = vmul.f32 %v1246_v2, %v1726_v61  ;;  %v800_v44 = vmul.f32 %v1246_v2, %v1734_v4  ;;  %v801_v47 = vmul.f32 %v1246_v2, %v1743_v48  ;;  %v783_v18 = vadd.f32 1e-05, %v777_v1 }
 0x269   : > { %969 = vst [vmem:[%s1913_s29 + $0x10] sm:$0xff] %v933_v5  ;;  %970 = vst [vmem:[%s1913_s29 + $0x18] sm:$0xff] %v934_v6  ;;  %v802_v57 = vmul.f32 %v1246_v2, %v1746_v9  ;;  %v865_v33 = vmul.f32 %v1882_v22, %v797_v25  ;;  %v866_v28 = vmul.f32 %v1884_v12, %v798_v23  ;;  %v778_v42 = vmul.f32 0.0013020834, %v772_v8  ;;  %v907_v5 = vld [vmem:[#allocation2 + $0x60] sm:$0xff]  ;;  %v908_v6 = vld [vmem:[#allocation2 + $0x68] sm:$0xff] }
 0x26a   : > { %971 = vst [vmem:[%s1913_s29 + $0x20] sm:$0xff] %v935_v19  ;;  %972 = vst [vmem:[%s1913_s29 + $0x28] sm:$0xff] %v936_v31  ;;  %v1248_v61 = vpop.eup %1247  ;;  %v867_v4 = vmul.f32 %v1886_v30, %v799_v56  ;;  %v868_v48 = vmul.f32 %v1888_v41, %v800_v44  ;;  %v869_v9 = vmul.f32 %v1894_v32, %v801_v47  ;;  %v909_v19 = vld [vmem:[#allocation2 + $0x70] sm:$0xff]  ;;  %v911_v23 = vld [vmem:[#allocation2 + $0x80] sm:$0xff]  ;;  %1251 = vrsqrt.f32 %v783_v18 }
 0x26b   : > { %v870_v43 = vmul.f32 %v1896_v34, %v802_v57  ;;  %v937_v46 = vadd.f32 %v901_v7, %v865_v33  ;;  %v938_v52 = vadd.f32 %v902_v36, %v866_v28  ;;  %v803_v2 = vmul.f32 %v1248_v61, %v1751_v16  ;;  %v912_v36 = vld [vmem:[#allocation2 + $0x88] sm:$0xff] }
 0x26c   : > { %v804_v50 = vmul.f32 %v1248_v61, %v1754_v17  ;;  %v939_v60 = vadd.f32 %v903_v51, %v867_v4  ;;  %v940_v1 = vadd.f32 %v904_v10, %v868_v48  ;;  %v941_v54 = vadd.f32 %v905_v26, %v869_v9  ;;  %v910_v17 = vld [vmem:[#allocation2 + $0x78] sm:$0xff]  ;;  %v915_v4 = vld [vmem:[#allocation2 + $0xa0] sm:$0xff] }
 0x26d   : > { %v942_v45 = vadd.f32 %v906_v38, %v870_v43  ;;  %973 = vst [vmem:[%s1913_s29 + $0x30] sm:$0xff] %v937_v46  ;;  %974 = vst [vmem:[%s1913_s29 + $0x38] sm:$0xff] %v938_v52  ;;  %v805_v31 = vmul.f32 %v1248_v61, %v1761_v55  ;;  %v806_v7 = vmul.f32 %v1248_v61, %v1764_v24  ;;  %v784_v55 = vadd.f32 1e-05, %v778_v42  ;;  %v1250_v24 = vpop.eup %1249  ;;  %v913_v42 = vld [vmem:[#allocation2 + $0x90] sm:$0xff]  ;;  %v918_v52 = vld [vmem:[#allocation2 + $0xb8] sm:$0xff] }
 0x26e   : > { %v807_v16 = vmul.f32 %v1248_v61, %v1775_v62  ;;  %v808_v25 = vmul.f32 %v1248_v61, %v1789_v59  ;;  %975 = vst [vmem:[%s1913_s29 + $0x40] sm:$0xff] %v939_v60  ;;  %976 = vst [vmem:[%s1913_s29 + $0x48] sm:$0xff] %v940_v1  ;;  %v871_v51 = vmul.f32 %v1882_v22, %v803_v2  ;;  %v914_v61 = vld [vmem:[#allocation2 + $0x98] sm:$0xff]  ;;  %v917_v46 = vld [vmem:[#allocation2 + $0xb0] sm:$0xff] }
 0x26f   : > { %977 = vst [vmem:[%s1913_s29 + $0x50] sm:$0xff] %v941_v54  ;;  %978 = vst [vmem:[%s1913_s29 + $0x58] sm:$0xff] %v942_v45  ;;  %v872_v10 = vmul.f32 %v1884_v12, %v804_v50  ;;  %v873_v62 = vmul.f32 %v1886_v30, %v805_v31  ;;  %v874_v59 = vmul.f32 %v1888_v41, %v806_v7  ;;  %1253 = vrsqrt.f32 %v784_v55  ;;  %v919_v31 = vld [vmem:[#allocation2 + $0xc0] sm:$0xff] }
 0x270   : > { %v875_v56 = vmul.f32 %v1894_v32, %v807_v16  ;;  %v876_v44 = vmul.f32 %v1896_v34, %v808_v25  ;;  %v943_v47 = vadd.f32 %v907_v5, %v871_v51  ;;  %v809_v8 = vmul.f32 %v1250_v24, %v1778_v53  ;;  %v922_v51 = vld [vmem:[#allocation2 + $0xd8] sm:$0xff] }
 0x271   : > { %v944_v57 = vadd.f32 %v908_v6, %v872_v10  ;;  %v810_v26 = vmul.f32 %v1250_v24, %v1783_v29  ;;  %v945_v38 = vadd.f32 %v909_v19, %v873_v62  ;;  %v946_v33 = vadd.f32 %v910_v17, %v874_v59  ;;  %v916_v29 = vld [vmem:[#allocation2 + $0xa8] sm:$0xff] }
 0x272   : > { %v947_v28 = vadd.f32 %v911_v23, %v875_v56  ;;  %v948_v18 = vadd.f32 %v912_v36, %v876_v44  ;;  %979 = vst [vmem:[%s1913_s29 + $0x60] sm:$0xff] %v943_v47  ;;  %v811_v48 = vmul.f32 %v1250_v24, %v1786_v0  ;;  %v812_v9 = vmul.f32 %v1250_v24, %v1794_v35  ;;  %v920_v23 = vld [vmem:[#allocation2 + $0xc8] sm:$0xff]  ;;  %v921_v36 = vld [vmem:[#allocation2 + $0xd0] sm:$0xff] }
 0x273   : > { %980 = vst [vmem:[%s1913_s29 + $0x68] sm:$0xff] %v944_v57  ;;  %v813_v53 = vmul.f32 %v1250_v24, %v1803_v63  ;;  %v814_v43 = vmul.f32 %v1250_v24, %v1816_v3  ;;  %981 = vst [vmem:[%s1913_s29 + $0x70] sm:$0xff] %v945_v38  ;;  %v877_v2 = vmul.f32 %v1882_v22, %v809_v8  ;;  %v923_v24 = vld [vmem:[#allocation2 + $0xe0] sm:$0xff]  ;;  %v924_v62 = vld [vmem:[#allocation2 + $0xe8] sm:$0xff] }
 0x274   : > { %982 = vst [vmem:[%s1913_s29 + $0x78] sm:$0xff] %v946_v33  ;;  %983 = vst [vmem:[%s1913_s29 + $0x80] sm:$0xff] %v947_v28  ;;  %v878_v0 = vmul.f32 %v1884_v12, %v810_v26  ;;  %v879_v35 = vmul.f32 %v1886_v30, %v811_v48  ;;  %v880_v63 = vmul.f32 %v1888_v41, %v812_v9  ;;  %v1252_v19 = vpop.eup %1251  ;;  %v925_v28 = vld [vmem:[#allocation2 + $0xf0] sm:$0xff] }
 0x275   : > { %984 = vst [vmem:[%s1913_s29 + $0x88] sm:$0xff] %v948_v18  ;;  %v881_v3 = vmul.f32 %v1894_v32, %v813_v53  ;;  %v882_v50 = vmul.f32 %v1896_v34, %v814_v43  ;;  %v949_v60 = vadd.f32 %v913_v42, %v877_v2  ;;  %v815_v7 = vmul.f32 %v1252_v19, %v1808_v20  ;;  %v926_v18 = vld [vmem:[#allocation2 + $0xf8] sm:$0xff]  ;;  %v927_v42 = vld [vmem:[#allocation2 + $0x100] sm:$0xff] }
 0x276   : > { %v950_v1 = vadd.f32 %v914_v61, %v878_v0  ;;  %v951_v54 = vadd.f32 %v915_v4, %v879_v35  ;;  %v952_v45 = vadd.f32 %v916_v29, %v880_v63  ;;  %v816_v16 = vmul.f32 %v1252_v19, %v1811_v21  ;;  %v930_v53 = vld [vmem:[#allocation2 + $0x118] sm:$0xff] }
 0x277   : > { %v953_v5 = vadd.f32 %v917_v46, %v881_v3  ;;  %v954_v6 = vadd.f32 %v918_v52, %v882_v50  ;;  %985 = vst [vmem:[%s1913_s29 + $0x90] sm:$0xff] %v949_v60  ;;  %v817_v25 = vmul.f32 %v1252_v19, %v1819_v39  ;;  %v818_v17 = vmul.f32 %v1252_v19, %v1828_v37 }
 0x278   : > { %986 = vst [vmem:[%s1913_s29 + $0x98] sm:$0xff] %v950_v1  ;;  %987 = vst [vmem:[%s1913_s29 + $0xa0] sm:$0xff] %v951_v54  ;;  %v819_v10 = vmul.f32 %v1252_v19, %v1833_v58  ;;  %v820_v55 = vmul.f32 %v1252_v19, %v1849_v11  ;;  %v883_v59 = vmul.f32 %v1882_v22, %v815_v7 }
 0x279   : > { %988 = vst [vmem:[%s1913_s29 + $0xa8] sm:$0xff] %v952_v45  ;;  %989 = vst [vmem:[%s1913_s29 + $0xb0] sm:$0xff] %v953_v5  ;;  %v884_v20 = vmul.f32 %v1884_v12, %v816_v16  ;;  %v885_v21 = vmul.f32 %v1886_v30, %v817_v25  ;;  %v886_v39 = vmul.f32 %v1888_v41, %v818_v17  ;;  %v1254_v11 = vpop.eup %1253 }
 0x27a   : > { %990 = vst [vmem:[%s1913_s29 + $0xb8] sm:$0xff] %v954_v6  ;;  %v887_v37 = vmul.f32 %v1894_v32, %v819_v10  ;;  %v888_v58 = vmul.f32 %v1896_v34, %v820_v55  ;;  %v955_v56 = vadd.f32 %v919_v31, %v883_v59  ;;  %v821_v38 = vmul.f32 %v1254_v11, %v1836_v49  ;;  %v928_v49 = vld [vmem:[#allocation2 + $0x108] sm:$0xff] }
 0x27b   : > { %v956_v44 = vadd.f32 %v920_v23, %v884_v20  ;;  %v957_v47 = vadd.f32 %v921_v36, %v885_v21  ;;  %v958_v57 = vadd.f32 %v922_v51, %v886_v39  ;;  %v822_v33 = vmul.f32 %v1254_v11, %v1841_v27  ;;  %v929_v27 = vld [vmem:[#allocation2 + $0x110] sm:$0xff] }
 0x27c   : > { %v959_v8 = vadd.f32 %v923_v24, %v887_v37  ;;  %v960_v26 = vadd.f32 %v924_v62, %v888_v58  ;;  %991 = vst [vmem:[%s1913_s29 + $0xc0] sm:$0xff] %v955_v56  ;;  %v823_v61 = vmul.f32 %v1254_v11, %v1844_v14  ;;  %v824_v4 = vmul.f32 %v1254_v11, %v1856_v40 }
 0x27d   : > { %992 = vst [vmem:[%s1913_s29 + $0xc8] sm:$0xff] %v956_v44  ;;  %993 = vst [vmem:[%s1913_s29 + $0xd0] sm:$0xff] %v957_v47  ;;  %v825_v48 = vmul.f32 %v1254_v11, %v1863_v15  ;;  %v826_v9 = vmul.f32 %v1254_v11, %v1870_v13  ;;  %v889_v43 = vmul.f32 %v1882_v22, %v821_v38 }
 0x27e   : > { %994 = vst [vmem:[%s1913_s29 + $0xd8] sm:$0xff] %v958_v57  ;;  %995 = vst [vmem:[%s1913_s29 + $0xe0] sm:$0xff] %v959_v8  ;;  %v890_v29 = vmul.f32 %v1884_v12, %v822_v33  ;;  %v891_v14 = vmul.f32 %v1886_v30, %v823_v61  ;;  %v892_v40 = vmul.f32 %v1888_v41, %v824_v4 }
 0x27f   : > { %996 = vst [vmem:[%s1913_s29 + $0xe8] sm:$0xff] %v960_v26  ;;  %v893_v15 = vmul.f32 %v1894_v32, %v825_v48  ;;  %v894_v13 = vmul.f32 %v1896_v34, %v826_v9  ;;  %v961_v46 = vadd.f32 %v925_v28, %v889_v43 }
 0x280   : > { %v962_v52 = vadd.f32 %v926_v18, %v890_v29  ;;  %v963_v22 = vadd.f32 %v927_v42, %v891_v14  ;;  %v964_v12 = vadd.f32 %v928_v49, %v892_v40 }
 0x281   : > { %v965_v30 = vadd.f32 %v929_v27, %v893_v15  ;;  %v966_v41 = vadd.f32 %v930_v53, %v894_v13  ;;  %997 = vst [vmem:[%s1913_s29 + $0xf0] sm:$0xff] %v961_v46 }
 0x282   : > { %998 = vst [vmem:[%s1913_s29 + $0xf8] sm:$0xff] %v962_v52  ;;  %999 = vst [vmem:[%s1913_s29 + $0x100] sm:$0xff] %v963_v22 }
 0x283   : > { %1000 = vst [vmem:[%s1913_s29 + $0x108] sm:$0xff] %v964_v12  ;;  %1001 = vst [vmem:[%s1913_s29 + $0x110] sm:$0xff] %v965_v30 }
 0x284   : > { %1002 = vst [vmem:[%s1913_s29 + $0x118] sm:$0xff] %v966_v41 }
 0x285   : > { %1296 = shalt.err (!%p1293_p6)
}
 0x286   : > { %s1297_s22 = scalar_lea.hbm %s2008_s9, 4608  ;;  %s1301_s26 = scalar_lea.hbm %s2070_s4, 9216 }
 0x287   : > { %p1298_p7 = scmp.ne.s32.totalorder %s2008_s9, %s1297_s22  ;;  %p1302_p0 = scmp.lt.u32.totalorder %s2008_s9, %s2070_s4 }
 0x288   : > { %p1303_p2 = scmp.lt.u32.totalorder %s1301_s26, %s1297_s22  ;;  %p1305_p8 = scmp.lt.u32.totalorder %s1297_s22, %s2008_s9 }
 0x289   : > { %p1299_p9 = pnand %p1298_p7, %p2084_p10 }
 0x28a   : > { %p1304_p4 = por %p1303_p2, %p1302_p0 }
 0x28b   : > { %p1300_p12 = pneg %p1299_p9 }
 0x28c   : > { %p1306_p11 = por %p1305_p8, %p1304_p4 }
 0x28e   : > { %p1307_p13 = pnand %p1306_p11, %p1300_p12 }
 0x290   : > { %1310 = shalt.err (!%p1307_p13)
}
 0x291   : > { %s1373_s29 = smov 768   ;;  %s1374_s8 = smov 48  }
 0x292   : > { %1175 = dma.vmem_to_hbm [thread:$0]  (%p2084_p10), %s2010_s6, 4608, %s2008_s9, %s2020_s10, %s1373_s29, %s1373_s29, %s1374_s8  }
 0x293 PF: > { %p1187_p1 = scmp.ge.s32.totalorder %s1365_s20, 2  ;;  %s1035_s18 = sand.u32 1, %s1345_s15  }
 0x294   : > { %p2085_p3 = scmp.ne.s32.totalorder %s2076_s27, 0  ;;  %s1036_s30 = scalar_lea.sflag [#allocation4], %s1035_s18 }
 0x296   : > { %p1182_p5 = pnand %p1187_p1, %p2085_p3 }
 0x298   : > { %1340 = dma.done.wait (!%p1182_p5), %s1036_s30, 4608  }
 0x299   : > { %1342 = vsyncadd (!%p1182_p5), %s1036_s30, 4294962688  ;;  %s18_s20 = sadd.s32 1, %s1365_s20   ;;  %s2086_s15 = smov %s1349_s16 }
 0x29a   : > { %p15_p6 = scmp.ge.s32.totalorder %s18_s20, 4   ;;  %s2087_s16 = smov %s1353_s17 }
 0x29b   : > { %s2088_s17 = smov %s1453_s28  ;;  %s2089_s18 = smov %s1361_s19 }
 0x29c   : > { %s2090_s19 = smov %s2092_s23  ;;  %17 = sbr.rel (!%p15_p6) target bundleno = 5 (0x5), region = 77 }
 0x2a3   :  { %1041 = vsyncpa [#allocation3], 1 }
 0x2a4   :  { %1043 = vsyncpa [#allocation3 + $0x1], 1 }
 0x2a5   :  { %1044 = vsyncpa [#allocation4], 1 }
 0x2a6   :  { %1046 = vsyncpa [#allocation4 + $0x1], 1 }

</bundles_post_ra>
